<compile_context>
chip_gen: v7x
topology: tpu7x:2x2x1
jax: 0.10.0
libtpu: 0.0.40
codegen_flags: <defaults>
</compile_context>

<pallas_src>
import functools

import jax
import jax.numpy as jnp
from jax import lax
from jax.experimental import pallas as pl
from jax.experimental.pallas import tpu as pltpu


_VMEM_LIMIT = 32 * 1024 * 1024   # scoped-VMEM budget; safe for v7x (64 MiB physical) and below


def _round_up(x, m):
    return ((x + m - 1) // m) * m


def _pick_tile(size, cap, quantum):
    """Largest tile <= cap that divides `size` (size is a multiple of `quantum`)."""
    if size <= cap:
        return size
    t = cap
    while size % t != 0:
        t -= quantum
    return t


# ----------------------------- Pallas kernels ------------------------------------------------

def _mm_kernel(a_ref, b_ref, bias_ref, o_ref, acc_ref, *, act):
    """Tiled matmul; f32 accumulator initialized with bias at k==0; fused activation epilogue."""
    k = pl.program_id(2)

    @pl.when(k == 0)
    def _():
        acc_ref[...] = jnp.broadcast_to(bias_ref[...].astype(jnp.float32), acc_ref.shape)

    acc_ref[...] += jnp.dot(a_ref[...], b_ref[...], preferred_element_type=jnp.float32)

    @pl.when(k == pl.num_programs(2) - 1)
    def _():
        y = acc_ref[...]
        if act == "leaky_relu":
            y = jnp.where(y > 0, y, 0.2 * y)
        elif act == "tanh":
            y = jnp.tanh(y)
        o_ref[...] = y.astype(o_ref.dtype)


def _conv3x3_kernel(x0_ref, x1_ref, x2_ref, w_ref, b_ref, o_ref, *, width):
    """3x3 conv, one output row per grid step.

    x{kh}_ref: (1, 1, W+2, Cp) bf16 -- padded input rows h, h+1, h+2
    w_ref:     (3, 3, Cp, Cop) bf16 (resident: constant block index)
    b_ref:     (1, Cop) f32
    o_ref:     (1, 1, W, Cop) bf16
    """
    cop = o_ref.shape[-1]
    acc = jnp.broadcast_to(b_ref[...].astype(jnp.float32), (width, cop))
    rows = (x0_ref[0, 0], x1_ref[0, 0], x2_ref[0, 0])           # each (W+2, Cp) bf16
    for kh in range(3):
        row = rows[kh]
        for kw in range(3):
            a = row[kw:kw + width, :]                           # static sublane-offset slice
            acc = acc + jnp.dot(a, w_ref[kh, kw], preferred_element_type=jnp.float32)
    o_ref[0, 0] = acc.astype(o_ref.dtype)


def _adain_kernel(x_ref, s_ref, b_ref, o_ref):
    """Fused InstanceNorm2d (biased var, eps=1e-5) + per-sample style mod + LeakyReLU(0.2).

    Block = one sample x one 128-channel tile: x (1, H*W, TC) bf16, s/b (1, 1, TC) f32.
    """
    x = x_ref[...].astype(jnp.float32)
    mean = jnp.mean(x, axis=1, keepdims=True)
    var = jnp.mean(jnp.square(x - mean), axis=1, keepdims=True)
    y = (x - mean) * lax.rsqrt(var + 1e-5) * s_ref[...] + b_ref[...]
    o_ref[...] = jnp.where(y > 0, y, 0.2 * y).astype(o_ref.dtype)


# ----------------------------- Pallas wrappers ------------------------------------------------

def matmul_bias_act(a, b, bias, act=None, out_dtype=jnp.bfloat16):
    """(M,K) @ (K,N) + bias with fused activation.

    `b` (K,N) and `bias` (1,N) must be pre-padded (K, N multiples of 128) and pre-cast (bf16 /
    f32) at init.  `a` is only padded/cast here if it is not already in the padded bf16 layout
    (that only happens for tiny latent/style matrices).  Returns the PADDED (Mp, N) result so
    downstream matmuls can consume it without re-padding.
    """
    M, K = a.shape
    Kb, N = b.shape
    assert K <= Kb and Kb % 128 == 0 and N % 128 == 0

    Mp = _round_up(M, 8) if M <= 512 else _round_up(M, 512)
    if a.shape == (Mp, Kb) and a.dtype == jnp.bfloat16:
        ap = a                                                   # already padded bf16: no copy
    else:
        ap = jnp.zeros((Mp, Kb), jnp.bfloat16).at[:M, :K].set(a.astype(jnp.bfloat16))

    TM = _pick_tile(Mp, 512, 8)
    TN = _pick_tile(N, 2048, 128)      # full N whenever it fits: A panel streamed exactly once
    TK = _pick_tile(Kb, 1024, 128)
    grid = (Mp // TM, N // TN, Kb // TK)
    kern = functools.partial(_mm_kernel, act=act)

    out = pl.pallas_call(
        kern,
        out_shape=jax.ShapeDtypeStruct((Mp, N), out_dtype),
        grid_spec=pltpu.PrefetchScalarGridSpec(
            num_scalar_prefetch=0,
            grid=grid,
            in_specs=[
                pl.BlockSpec((TM, TK), lambda i, j, k: (i, k)),
                pl.BlockSpec((TK, TN), lambda i, j, k: (k, j)),
                pl.BlockSpec((1, TN), lambda i, j, k: (0, j)),
            ],
            out_specs=pl.BlockSpec((TM, TN), lambda i, j, k: (i, j)),
            scratch_shapes=[pltpu.VMEM((TM, TN), jnp.float32)],
        ),
        compiler_params=pltpu.CompilerParams(
            dimension_semantics=("parallel", "parallel", "arbitrary"),
            vmem_limit_bytes=_VMEM_LIMIT,
        ),
        cost_estimate=pl.CostEstimate(
            flops=2 * Mp * N * Kb,
            transcendentals=Mp * N if act == "tanh" else 0,
            bytes_accessed=2 * (Mp * Kb + Kb * N + Mp * N) + 4 * N,
        ),
    )(ap, b, bias)
    return out


def conv3x3(x, w, b):
    """3x3 conv, stride 1, padding 1.  x: (B,H,W,Cp) bf16; w: (3,3,Cp,Cop) bf16; b: (1,Cop) f32."""
    B, H, W, Cp = x.shape
    Cop = w.shape[-1]
    xp = jnp.pad(x, ((0, 0), (1, 1), (1, 1), (0, 0)))            # zero halo for the 3x3 taps
    Wp = W + 2
    kern = functools.partial(_conv3x3_kernel, width=W)

    return pl.pallas_call(
        kern,
        out_shape=jax.ShapeDtypeStruct((B, H, W, Cop), jnp.bfloat16),
        grid_spec=pltpu.PrefetchScalarGridSpec(
            num_scalar_prefetch=0,
            grid=(B, H),
            in_specs=[
                pl.BlockSpec((1, 1, Wp, Cp), lambda n, h: (n, h, 0, 0)),
                pl.BlockSpec((1, 1, Wp, Cp), lambda n, h: (n, h + 1, 0, 0)),
                pl.BlockSpec((1, 1, Wp, Cp), lambda n, h: (n, h + 2, 0, 0)),
                pl.BlockSpec((3, 3, Cp, Cop), lambda n, h: (0, 0, 0, 0)),   # resident weights
                pl.BlockSpec((1, Cop), lambda n, h: (0, 0)),                # resident bias
            ],
            out_specs=pl.BlockSpec((1, 1, W, Cop), lambda n, h: (n, h, 0, 0)),
        ),
        compiler_params=pltpu.CompilerParams(
            dimension_semantics=("parallel", "parallel"),
            vmem_limit_bytes=_VMEM_LIMIT,
        ),
        cost_estimate=pl.CostEstimate(
            flops=2 * B * H * W * Cop * 9 * Cp,
            transcendentals=0,
            bytes_accessed=2 * (3 * B * H * Wp * Cp + 9 * Cp * Cop + B * H * W * Cop) + 4 * Cop,
        ),
    )(xp, xp, xp, w, b)


def adain_leaky_relu(x, scale, bias):
    """x: (B,H,W,Cp) bf16; scale/bias: (B,1,Cp) f32.  Fused IN + style mod + LeakyReLU -> bf16."""
    B, H, W, Cp = x.shape
    HW = H * W
    TC = 128
    xr = x.reshape(B, HW, Cp)                                    # leading-dim merge: free

    y = pl.pallas_call(
        _adain_kernel,
        out_shape=jax.ShapeDtypeStruct((B, HW, Cp), jnp.bfloat16),
        grid_spec=pltpu.PrefetchScalarGridSpec(
            num_scalar_prefetch=0,
            grid=(B, Cp // TC),
            in_specs=[
                pl.BlockSpec((1, HW, TC), lambda n, c: (n, 0, c)),
                pl.BlockSpec((1, 1, TC), lambda n, c: (n, 0, c)),
                pl.BlockSpec((1, 1, TC), lambda n, c: (n, 0, c)),
            ],
            out_specs=pl.BlockSpec((1, HW, TC), lambda n, c: (n, 0, c)),
        ),
        compiler_params=pltpu.CompilerParams(
            dimension_semantics=("parallel", "parallel"),
            vmem_limit_bytes=_VMEM_LIMIT,
        ),
        cost_estimate=pl.CostEstimate(
            flops=10 * B * HW * Cp,
            transcendentals=B * Cp,
            bytes_accessed=2 * 2 * B * HW * Cp + 4 * 2 * B * Cp,
        ),
    )(xr, scale, bias)
    return y.reshape(B, H, W, Cp)


# ----------------------------- upsample glue (plain JAX, bf16) --------------------------------

def upsample_bilinear_2x(x):
    """nn.Upsample(scale_factor=2, mode='bilinear'), align_corners=False.  NHWC bf16, separable."""
    def up_axis(v, ax):
        n = v.shape[ax]
        first = lax.slice_in_dim(v, 0, 1, axis=ax)
        last = lax.slice_in_dim(v, n - 1, n, axis=ax)
        prev = jnp.concatenate([first, lax.slice_in_dim(v, 0, n - 1, axis=ax)], axis=ax)
        nxt = jnp.concatenate([lax.slice_in_dim(v, 1, n, axis=ax), last], axis=ax)
        even = 0.25 * prev + 0.75 * v        # output 2j   (src coord j - 0.25, edge-clamped)
        odd = 0.75 * v + 0.25 * nxt          # output 2j+1 (src coord j + 0.25, edge-clamped)
        st = jnp.stack([even, odd], axis=ax + 1)
        shp = list(v.shape)
        shp[ax] = 2 * n
        return st.reshape(shp)

    return up_axis(up_axis(x, 1), 2)


# ----------------------------- parameters (pre-padded, pre-cast at init) ----------------------

def _uniform(key, shape, bound):
    return jax.random.uniform(key, shape, jnp.float32, -bound, bound)


def _linear_params(key, in_f, out_f):
    """PyTorch-default-init Linear, stored as padded (Kp, Np) bf16 weight + (1, Np) f32 bias."""
    k1, k2 = jax.random.split(key)
    bound = 1.0 / (in_f ** 0.5)
    w = _uniform(k1, (out_f, in_f), bound)
    b = _uniform(k2, (out_f,), bound)
    kp, np_ = _round_up(in_f, 128), _round_up(out_f, 128)
    wp = jnp.zeros((kp, np_), jnp.bfloat16).at[:in_f, :out_f].set(w.T.astype(jnp.bfloat16))
    bp = jnp.zeros((1, np_), jnp.float32).at[0, :out_f].set(b)
    return wp, bp


def _conv3x3_params(key, in_c, out_c):
    k1, k2 = jax.random.split(key)
    bound = 1.0 / ((in_c * 9) ** 0.5)
    w = _uniform(k1, (out_c, in_c, 3, 3), bound)
    b = _uniform(k2, (out_c,), bound)
    cp, cop = _round_up(in_c, 128), _round_up(out_c, 128)
    wt = jnp.transpose(w, (2, 3, 1, 0))                          # (3, 3, c_in, c_out)
    wp = jnp.zeros((3, 3, cp, cop), jnp.bfloat16).at[:, :, :in_c, :out_c].set(
        wt.astype(jnp.bfloat16))
    bp = jnp.zeros((1, cop), jnp.float32).at[0, :out_c].set(b)
    return wp, bp


def _conv1x1_params(key, in_c, out_c):
    k1, k2 = jax.random.split(key)
    bound = 1.0 / (in_c ** 0.5)
    w = _uniform(k1, (out_c, in_c), bound)
    b = _uniform(k2, (out_c,), bound)
    cp, cop = _round_up(in_c, 128), _round_up(out_c, 128)
    wp = jnp.zeros((cp, cop), jnp.bfloat16).at[:in_c, :out_c].set(w.T.astype(jnp.bfloat16))
    bp = jnp.zeros((1, cop), jnp.float32).at[0, :out_c].set(b)
    return wp, bp


def _adain_style_block(key, style_in, kp_style, c):
    """Both AdaIN Linears (scale, bias) for one layer, as a (kp_style, 2*cp) column block."""
    cp = _round_up(c, 128)
    ks = jax.random.split(key, 4)
    bound = 1.0 / (style_in ** 0.5)
    blocks_w, blocks_b = [], []
    for kw_, kb_ in ((ks[0], ks[1]), (ks[2], ks[3])):            # style_scale, style_bias
        w_raw = _uniform(kw_, (c, style_in), bound)
        b_raw = _uniform(kb_, (c,), bound)
        blocks_w.append(jnp.zeros((kp_style, cp), jnp.bfloat16)
                        .at[:style_in, :c].set(w_raw.T.astype(jnp.bfloat16)))
        blocks_b.append(jnp.zeros((1, cp), jnp.float32).at[0, :c].set(b_raw))
    return jnp.concatenate(blocks_w, axis=1), jnp.concatenate(blocks_b, axis=1), cp


def init_stylegan2_params(key, input_nc, output_nc, ngf, n_layers, style_dim,
                          mapping_layers, use_mapping_network=True):
    keys = iter(jax.random.split(key, 4 + mapping_layers + 4 * n_layers))
    params = {"use_mapping_network": use_mapping_network, "output_nc": output_nc}

    if use_mapping_network:
        mapping = []
        in_f = input_nc
        for _ in range(mapping_layers):
            mapping.append(_linear_params(next(keys), in_f, style_dim))
            in_f = style_dim
        params["mapping"] = mapping
    style_in = style_dim if use_mapping_network else input_nc
    kp_style = _round_up(style_in, 128)

    # constant input, pre-stored as NHWC bf16 with 128-padded channels
    const = jax.random.normal(next(keys), (1, ngf, 4, 4), jnp.float32)
    cgp = _round_up(ngf, 128)
    params["const"] = jnp.zeros((1, 4, 4, cgp), jnp.bfloat16).at[..., :ngf].set(
        jnp.transpose(const, (0, 2, 3, 1)).astype(jnp.bfloat16))

    layers, w_blocks, b_blocks, mod_offsets = [], [], [], []
    off = 0
    cur = ngf
    for i in range(n_layers):
        layer = {}
        layer["conv1"] = _conv3x3_params(next(keys), cur, cur)
        wb, bb, cp = _adain_style_block(next(keys), style_in, kp_style, cur)
        w_blocks.append(wb); b_blocks.append(bb); mod_offsets.append((off, cp)); off += 2 * cp
        nxt = cur // 2 if i > n_layers // 2 else cur
        layer["conv2"] = _conv3x3_params(next(keys), cur, nxt)
        wb, bb, cp = _adain_style_block(next(keys), style_in, kp_style, nxt)
        w_blocks.append(wb); b_blocks.append(bb); mod_offsets.append((off, cp)); off += 2 * cp
        cur = nxt
        layers.append(layer)

    params["layers"] = layers
    params["style_w"] = jnp.concatenate(w_blocks, axis=1)        # one batched style matmul
    params["style_b"] = jnp.concatenate(b_blocks, axis=1)
    params["mod_offsets"] = mod_offsets
    params["final"] = _conv1x1_params(next(keys), cur, output_nc)
    return params


# ----------------------------- forward ---------------------------------------------------------

def stylegan2_generator_forward(params, x):
    """x: latent input, 2D (B, input_nc) or 4D (B, c, h, w) with c*h*w == input_nc.
    Returns NCHW image of shape (B, output_nc, 4 * 2**(n_layers-1), ...)."""
    if x.ndim == 4:
        x = x.reshape(x.shape[0], -1)
    B = x.shape[0]
    style = x.astype(jnp.float32)

    # mapping network: [Linear + LeakyReLU(0.2)] * mapping_layers (activation fused in matmul;
    # intermediate style stays in the padded bf16 layout -> no re-pad between layers)
    if params["use_mapping_network"]:
        for (w, b) in params["mapping"]:
            style = matmul_bias_act(style, w, b, act="leaky_relu", out_dtype=jnp.bfloat16)

    # ALL AdaIN style scale/bias linears fused into one matmul hoisted above the layer loop.
    mods = matmul_bias_act(style, params["style_w"], params["style_b"],
                           act=None, out_dtype=jnp.float32)

    const = params["const"]
    h = jnp.broadcast_to(const, (B,) + const.shape[1:])          # (B, 4, 4, Cp) bf16

    mi = 0
    for i, layer in enumerate(params["layers"]):
        if i > 0:
            h = upsample_bilinear_2x(h)
        for name in ("conv1", "conv2"):
            w, b = layer[name]
            h = conv3x3(h, w, b)
            off, cp = params["mod_offsets"][mi]; mi += 1
            sc = mods[:B, off:off + cp].reshape(B, 1, cp)        # 128-aligned column window
            bi = mods[:B, off + cp:off + 2 * cp].reshape(B, 1, cp)
            h = adain_leaky_relu(h, sc, bi)                      # IN + style mod + LeakyReLU

    wf, bf_ = params["final"]
    Bn, H, W, Cp = h.shape
    y = matmul_bias_act(h.reshape(Bn * H * W, Cp), wf, bf_, act="tanh", out_dtype=jnp.float32)
    y = y[:Bn * H * W, :params["output_nc"]].reshape(Bn, H, W, params["output_nc"])
    return jnp.transpose(y, (0, 3, 1, 2))                        # NHWC -> NCHW


# ----------------------------- demo ------------------------------------------------------------

if __name__ == "__main__":
    # Small config: input_nc=16 (latent), output 3x16x16 image (n_layers=3 -> 4*2^2 = 16).
    input_nc, output_nc, ngf, n_layers = 16, 3, 32, 3
    style_dim, mapping_layers = 64, 2

    key = jax.random.PRNGKey(0)
    kp, kx = jax.random.split(key)
    params = init_stylegan2_params(kp, input_nc, output_nc, ngf, n_layers,
                                   style_dim, mapping_layers)
    # 4D latent input exercising the flatten path: 4*2*2 == input_nc
    x = jax.random.normal(kx, (2, 4, 2, 2), jnp.float32)

    out = stylegan2_generator_forward(params, x)
    out = jax.block_until_ready(out)

    assert out.shape == (2, output_nc, 16, 16), out.shape
    assert bool(jnp.all(jnp.isfinite(out)))
    assert bool(jnp.all(jnp.abs(out) <= 1.0 + 1e-6))    # final Tanh range check
    print("KERNEL_OK")
</pallas_src>

<mosaic_0001>
module attributes {stable_mosaic.version = 11 : i64} {
  func.func @_mm_kernel(%arg0: i32, %arg1: i32, %arg2: i32, %arg3: memref<8x128xbf16, #tpu.memory_space<vmem>>, %arg4: memref<128x128xbf16, #tpu.memory_space<vmem>>, %arg5: memref<1x128xf32, #tpu.memory_space<vmem>>, %arg6: memref<8x128xbf16, #tpu.memory_space<vmem>>, %arg7: memref<8x128xf32, #tpu.memory_space<vmem>>) attributes {dimension_semantics = [#tpu.dimension_semantics<parallel>, #tpu.dimension_semantics<parallel>, #tpu.dimension_semantics<arbitrary>], iteration_bounds = array<i64: 1, 1, 1>, scalar_prefetch = 0 : i64, scratch_operands = 1 : i64, tpu.core_type = #tpu.core_type<tc>, window_params = [{transform_indices = @transform_0, window_bounds = array<i64: 8, 128>}, {transform_indices = @transform_1, window_bounds = array<i64: 128, 128>}, {transform_indices = @transform_2, window_bounds = array<i64: 1, 128>}, {transform_indices = @transform_3, window_bounds = array<i64: 8, 128>}]} {
    %c0_i32 = arith.constant 0 : i32
    %0 = arith.cmpi eq, %arg2, %c0_i32 : i32
    %1 = arith.extui %0 : i1 to i32
    %c0_i32_0 = arith.constant 0 : i32
    %2 = arith.cmpi ne, %1, %c0_i32_0 : i32
    scf.if %2 {
      %c0_10 = arith.constant 0 : index
      %c0_11 = arith.constant 0 : index
      %12 = vector.load %arg5[%c0_10, %c0_11] : memref<1x128xf32, #tpu.memory_space<vmem>>, vector<1x128xf32>
      %13 = vector.shape_cast %12 : vector<1x128xf32> to vector<1x128xf32>
      %14 = vector.broadcast %13 : vector<1x128xf32> to vector<8x128xf32>
      %c0_12 = arith.constant 0 : index
      %c0_13 = arith.constant 0 : index
      %15 = vector.load %arg7[%c0_12, %c0_13] : memref<8x128xf32, #tpu.memory_space<vmem>>, vector<8x128xf32>
      tpu.vector_store %arg7[%c0_12, %c0_13], %14 {strides = array<i32>} : memref<8x128xf32, #tpu.memory_space<vmem>>, vector<8x128xf32>,
    } else {
    }
    %c0 = arith.constant 0 : index
    %c0_1 = arith.constant 0 : index
    %3 = vector.load %arg7[%c0, %c0_1] : memref<8x128xf32, #tpu.memory_space<vmem>>, vector<8x128xf32>
    %c0_2 = arith.constant 0 : index
    %c0_3 = arith.constant 0 : index
    %4 = vector.load %arg3[%c0_2, %c0_3] : memref<8x128xbf16, #tpu.memory_space<vmem>>, vector<8x128xbf16>
    %c0_4 = arith.constant 0 : index
    %c0_5 = arith.constant 0 : index
    %5 = vector.load %arg4[%c0_4, %c0_5] : memref<128x128xbf16, #tpu.memory_space<vmem>>, vector<128x128xbf16>
    %cst = arith.constant dense<0.000000e+00> : vector<8x128xf32>
    %6 = tpu.matmul %4, %5, %cst {dimension_numbers = #tpu.dot_dimension_numbers<[1], [0], [0], [1], [0, 0, 1, 1], [], []>} : vector<8x128xbf16>, vector<128x128xbf16>, vector<8x128xf32> -> vector<8x128xf32>
    %7 = arith.addf %3, %6 : vector<8x128xf32>
    %c0_6 = arith.constant 0 : index
    %c0_7 = arith.constant 0 : index
    %8 = vector.load %arg7[%c0_6, %c0_7] : memref<8x128xf32, #tpu.memory_space<vmem>>, vector<8x128xf32>
    tpu.vector_store %arg7[%c0_6, %c0_7], %7 {strides = array<i32>} : memref<8x128xf32, #tpu.memory_space<vmem>>, vector<8x128xf32>,
    %c0_i32_8 = arith.constant 0 : i32
    %9 = arith.cmpi eq, %arg2, %c0_i32_8 : i32
    %10 = arith.extui %9 : i1 to i32
    %c0_i32_9 = arith.constant 0 : i32
    %11 = arith.cmpi ne, %10, %c0_i32_9 : i32
    scf.if %11 {
      %c0_10 = arith.constant 0 : index
      %c0_11 = arith.constant 0 : index
      %12 = vector.load %arg7[%c0_10, %c0_11] : memref<8x128xf32, #tpu.memory_space<vmem>>, vector<8x128xf32>
      %cst_12 = arith.constant 0.000000e+00 : f32
      %13 = vector.broadcast %cst_12 : f32 to vector<8x128xf32>
      %14 = arith.cmpf ogt, %12, %13 : vector<8x128xf32>
      %cst_13 = arith.constant 2.000000e-01 : f32
      %15 = vector.broadcast %cst_13 : f32 to vector<8x128xf32>
      %16 = arith.mulf %15, %12 : vector<8x128xf32>
      %17 = arith.select %14, %12, %16 : vector<8x128xi1>, vector<8x128xf32>
      %18 = arith.truncf %17 : vector<8x128xf32> to vector<8x128xbf16>
      %c0_14 = arith.constant 0 : index
      %c0_15 = arith.constant 0 : index
      %19 = vector.load %arg6[%c0_14, %c0_15] : memref<8x128xbf16, #tpu.memory_space<vmem>>, vector<8x128xbf16>
      tpu.vector_store %arg6[%c0_14, %c0_15], %18 {strides = array<i32>} : memref<8x128xbf16, #tpu.memory_space<vmem>>, vector<8x128xbf16>,
    } else {
    }
    return
  }
  func.func @transform_0(%arg0: i32, %arg1: i32, %arg2: i32) -> (i32, i32) {
    %c0_i32 = arith.constant 0 : i32
    return %arg0, %arg2 : i32, i32
  }
  func.func @transform_1(%arg0: i32, %arg1: i32, %arg2: i32) -> (i32, i32) {
    %c0_i32 = arith.constant 0 : i32
    return %arg2, %arg1 : i32, i32
  }
  func.func @transform_2(%arg0: i32, %arg1: i32, %arg2: i32) -> (i32, i32) {
    %c0_i32 = arith.constant 0 : i32
    %c0_i32_0 = arith.constant 0 : i32
    return %c0_i32, %arg1 : i32, i32
  }
  func.func @transform_3(%arg0: i32, %arg1: i32, %arg2: i32) -> (i32, i32) {
    %c0_i32 = arith.constant 0 : i32
    return %arg0, %arg1 : i32, i32
  }
}

</mosaic_0001>

<bundles_post_ra>
// kernel: tpu_custom_call.1
= control target key start
LH: loop header
LB: loop body
LE: loop exit
PB: predicated region body
PF: predicated region fallthrough
CT: control target
= control target key end

     0   :  { %8 = vsyncpa [#allocation4], 0  ;;  %s385_s0 = inlined_call_operand.hbm [shape: bf16[8,128], index: 0, kind: input, shape index: {}]   ;;  %s386_s1 = inlined_call_operand.hbm [shape: bf16[128,128], index: 1, kind: input, shape index: {}]   ;;  %s387_s2 = inlined_call_operand.vmem [shape: f32[1,128], index: 2, kind: input, shape index: {}]   ;;  %s388_s3 = inlined_call_operand.hbm [shape: bf16[8,128], index: 3, kind: output, shape index: {}]  }
   0x1   :  { %9 = vsyncpa [#allocation7], 0 }
   0x2   :  { %10 = vsyncpa [#allocation5], 0  ;;  %s312_s12 = smov [#allocation3]   ;;  %s313_s14 = smov [#allocation6]  }
   0x3   :  { %s17_s13 = sshll.u32 %s312_s12, 4  ;;  %s26_s15 = sshll.u32 %s313_s14, 4  ;;  %s18_s13 = int_to_ptr.vmem [resolvable:$true] %s17_s13  ;;  %s339_s15 = int_to_ptr.vmem [resolvable:$true] %s26_s15 }
   0x4   :  { %s240_s18 = scalar_lea.hbm %s385_s0, 64 }
   0x5   :  { %p241_p0 = scmp.ne.s32.totalorder %s385_s0, %s240_s18  ;;  %p244_p1 = scmp.lt.u32.totalorder %s240_s18, %s385_s0 }
   0x7   :  { %p246_p2 = pnand %p244_p1, %p241_p0 }
   0x9   :  { %249 = shalt.err (!%p246_p2)
}
   0xa   :  { %s250_s23 = scalar_lea.vmem %s18_s13, 64  ;;  %p255_p4 = scmp.lt.s32.totalorder %s18_s13, %s18_s13 }
   0xb   :  { %p251_p3 = scmp.ne.s32.totalorder %s18_s13, %s250_s23  ;;  %p256_p5 = scmp.lt.s32.totalorder %s250_s23, %s250_s23 }
   0xd   :  { %p257_p6 = por %p256_p5, %p255_p4 }
   0xf   :  { %p258_p7 = pnand %p257_p6, %p251_p3 }
  0x11   :  { %261 = shalt.err (!%p258_p7)
}
  0x12   :  { %20 = dma.hbm_to_vmem [thread:$0]  %s385_s0, 64, %s18_s13, [#allocation4]  }
  0x13   :  { %s262_s28 = scalar_lea.hbm %s386_s1, 1024 }
  0x14   :  { %p263_p8 = scmp.ne.s32.totalorder %s386_s1, %s262_s28  ;;  %p266_p9 = scmp.lt.u32.totalorder %s262_s28, %s386_s1 }
  0x16   :  { %p268_p10 = pnand %p266_p9, %p263_p8 }
  0x18   :  { %271 = shalt.err (!%p268_p10)
}
  0x19   :  { %s272_s6 = scalar_lea.vmem %s339_s15, 1024  ;;  %p277_p12 = scmp.lt.s32.totalorder %s339_s15, %s339_s15 }
  0x1a   :  { %p273_p11 = scmp.ne.s32.totalorder %s339_s15, %s272_s6  ;;  %p278_p13 = scmp.lt.s32.totalorder %s272_s6, %s272_s6 }
  0x1c   :  { %p279_p0 = por %p278_p13, %p277_p12 }
  0x1e   :  { %p280_p1 = pnand %p279_p0, %p273_p11 }
  0x20   :  { %283 = shalt.err (!%p280_p1)
}
  0x21   :  { %s314_s0 = smov 64   ;;  %s315_s7 = smov 4  }
  0x22   :  { %32 = dma.hbm_to_vmem [thread:$0]  %s386_s1, 1024, %s339_s15, [#allocation7], %s314_s0, %s314_s0, %s315_s7  }
  0x23   :  { %306 = dma.done.wait [#allocation4], 64  }
  0x24   :  { %307 = vsyncadd [#allocation4], 4294967232 }
  0x25   :  { %308 = dma.done.wait [#allocation7], 1024  }
  0x26   :  { %309 = vsyncadd [#allocation7], 4294966272  ;;  %v316_v0 = vmov 0.0   ;;  %vm317_vm0 = vmmov 0   ;;  %v232_v1 = vld [vmem:[#allocation6] sm:$0xff]   ;;  %v233_v2 = vld [vmem:[#allocation6 + $0x8] sm:$0xff]  }
  0x27   :  { %205 = vmatprep.subr.bf16.mxu0 %v316_v0  ;;  %221 = vmatprep.mubr.msk.bf16.mxu0 %vm317_vm0, %v316_v0  ;;  %v234_v3 = vld [vmem:[#allocation6 + $0x10] sm:$0xff]   ;;  %v235_v4 = vld [vmem:[#allocation6 + $0x18] sm:$0xff]   ;;  %v236_v5 = vld [vmem:[#allocation6 + $0x20] sm:$0xff]   ;;  %s318_s11 = smov [#allocation8]  }
  0x28   :  { %206 = vmatpush3.bf16.msra.mxu0 %v232_v1  ;;  %v237_v6 = vld [vmem:[#allocation6 + $0x28] sm:$0xff]   ;;  %v238_v7 = vld [vmem:[#allocation6 + $0x30] sm:$0xff]   ;;  %v239_v8 = vld [vmem:[#allocation6 + $0x38] sm:$0xff]   ;;  %s177_s12 = sshll.u32 %s318_s11, 4  ;;  %s178_s12 = int_to_ptr.vmem [resolvable:$true] %s177_s12 }
  0x29   :  { %207 = vmatprep.subr.bf16.mxu0 %v316_v0  ;;  %v55_v9 = vld [vmem:[#allocation3] sm:$0xf]  ;;  %s284_s13 = scalar_lea.vmem %s178_s12, 64  ;;  %p289_p3 = scmp.lt.s32.totalorder %s178_s12, %s178_s12 }
  0x2a   :  { %v187_v10 = vld [vmem:[%s387_s2] ss:$0 sm:$0xff]  ;;  %p285_p2 = scmp.ne.s32.totalorder %s178_s12, %s284_s13  ;;  %p290_p4 = scmp.lt.s32.totalorder %s284_s13, %s284_s13 }
  0x2c   :  { %208 = vmatpush3.bf16.msra.mxu0 %v233_v2  ;;  %p291_p5 = por %p290_p4, %p289_p3 }
  0x2d   :  { %209 = vmatprep.subr.bf16.mxu0 %v316_v0 }
  0x2e   :  { %p292_p6 = pnand %p291_p5, %p285_p2 }
  0x30   :  { %210 = vmatpush3.bf16.msra.mxu0 %v234_v3 }
  0x31   :  { %211 = vmatprep.subr.bf16.mxu0 %v316_v0 }
  0x34   :  { %212 = vmatpush3.bf16.msra.mxu0 %v235_v4 }
  0x35   :  { %213 = vmatprep.subr.bf16.mxu0 %v316_v0 }
  0x38   :  { %214 = vmatpush3.bf16.msra.mxu0 %v236_v5 }
  0x39   :  { %215 = vmatprep.subr.bf16.mxu0 %v316_v0 }
  0x3c   :  { %216 = vmatpush3.bf16.msra.mxu0 %v237_v6 }
  0x3d   :  { %217 = vmatprep.subr.bf16.mxu0 %v316_v0 }
  0x40   :  { %218 = vmatpush3.bf16.msra.mxu0 %v238_v7 }
  0x41   :  { %219 = vmatprep.subr.bf16.mxu0 %v316_v0 }
  0x44   :  { %220 = vmatpush3.bf16.msra.mxu0 %v239_v8 }
  0x47   :  { %222 = vmatmul.mubr.bf16.vlgmr.msra.gmra.mrb[0].mxu0 %v55_v9 }
 0x11a   :  { %v154_v11 = vpop.f32.mrb[0].mxu0 }
 0x11b   :  { %v160_v12 = vadd.f32 %v187_v10, %v154_v11  ;;  %v223_v13 = vpop.f32.mrb[1].mxu0 }
 0x11c   :  { %v157_v14 = vpop.f32.mrb[2].mxu0 }
 0x11d   :  { %vm166_vm1 = vcmp.gt.f32.partialorder %v160_v12, 0.0  ;;  %v167_v15 = vmul.f32 0.2, %v160_v12  ;;  %v224_v16 = vpop.f32.mrb[3].mxu0 }
 0x11f   :  { %v168_v17 = vsel %vm166_vm1, %v160_v12, %v167_v15 }
 0x120   :  { %v169_v18 = vpack.c.bf16 %v168_v17, %v168_v17 }
 0x122   :  { %170 = vst [vmem:[#allocation8] sm:$0xf] %v169_v18 }
 0x123   :  { %295 = shalt.err (!%p292_p6)
}
 0x124   :  { %s296_s15 = scalar_lea.hbm %s388_s3, 64 }
 0x125   :  { %p297_p7 = scmp.ne.s32.totalorder %s388_s3, %s296_s15  ;;  %p300_p8 = scmp.lt.u32.totalorder %s296_s15, %s388_s3 }
 0x127   :  { %p302_p9 = pnand %p300_p8, %p297_p7 }
 0x129   :  { %305 = shalt.err (!%p302_p9)
}
 0x12a   :  { %180 = dma.vmem_to_hbm [thread:$0]  %s178_s12, 64, %s388_s3, [#allocation5]  }
 0x12b   :  { %310 = dma.done.wait [#allocation5], 64  }
 0x12c   :  { %311 = vsyncadd [#allocation5], 4294967232 }
 0x12d   :  { %184 = vsyncpa [#allocation4], 1 }
 0x12e   :  { %185 = vsyncpa [#allocation7], 1 }
 0x12f   :  { %186 = vsyncpa [#allocation5], 1 }

</bundles_post_ra>
